<compile_context>
chip_gen: v7x
topology: tpu7x:2x2x1
jax: 0.10.0
libtpu: 0.0.40
codegen_flags: <defaults>
</compile_context>

<pallas_src>
import jax
import jax.numpy as jnp
from jax.experimental import pallas as pl
from jax.experimental.pallas import tpu as pltpu


def _round_up(n, m):
    return ((n + m - 1) // m) * m


def generator_kernel(x_ref, w1_ref, b1_ref, w2_ref, b2_ref, o_ref):
    """One batch tile of: tanh(x @ W1 + b1) @ w2 + b2 (output_dim == 1).

    x_ref : (TB, K)  bf16   streamed batch tile (K padded to 128-multiple)
    w1_ref: (K, H)   bf16   VMEM-resident across grid steps
    b1_ref: (1, H)   f32    VMEM-resident
    w2_ref: (1, H)   f32    second-layer weight as a row vector
    b2_ref: (1, 1)   f32    scalar bias in SMEM
    o_ref : (1, TB)  f32    lane-dense output row
    """
    # Layer 1: MXU matmul (bf16 operands, f32 accumulate); bias + tanh in f32.
    h = jnp.dot(x_ref[...], w1_ref[...], preferred_element_type=jnp.float32)
    h = jnp.tanh(h + b1_ref[...])                           # (TB, H) f32, EUP tanh

    # Layer 2 (N=1): VPU multiply + lane reduction (keeps the MXU free) and a
    # lane-dense store of the per-row scalars.
    row = jnp.sum(h * w2_ref[...], axis=-1)                 # (TB,) f32
    o_ref[...] = (row + b2_ref[0, 0])[None, :].astype(o_ref.dtype)


def generator_forward(x, w1, b1, w2, b2, *, block_b=2048):
    """x: [B, input_dim]; w1: [input_dim, hidden]; b1: [hidden];
    w2: [hidden, 1]; b2: [1]  ->  [B, 1] (float32)."""
    B, in_dim = x.shape
    hidden = w1.shape[1]
    out_dim = w2.shape[1]
    assert out_dim == 1, "kernel is specialized to the module's output_dim=1"

    LANE = 128
    # Pad feature dims to lane multiples with zeros (numerically exact:
    # padded K contributes 0 to the dot; padded H is multiplied by w2 zeros).
    kp = _round_up(in_dim, LANE)
    hp = _round_up(hidden, LANE)

    # Batch tile: multiple of 128 so the (1, TB) output block is lane-aligned
    # and the (TB, K) input block is sublane/packing-aligned. Sized well under
    # v7x's 64 MiB VMEM even with double-buffered inputs.
    block_b = max(LANE, _round_up(block_b, LANE))
    tb = min(block_b, _round_up(B, LANE))
    b_pad = _round_up(B, tb)
    grid = (b_pad // tb,)

    # ---- wrapper-side layout / dtype plumbing (pure data movement) ----
    xp = jnp.pad(x, ((0, b_pad - B), (0, kp - in_dim))).astype(jnp.bfloat16)
    w1p = jnp.pad(w1, ((0, kp - in_dim), (0, hp - hidden))).astype(jnp.bfloat16)
    b1p = jnp.pad(b1, (0, hp - hidden)).reshape(1, hp).astype(jnp.float32)
    w2p = jnp.pad(w2[:, 0], (0, hp - hidden)).reshape(1, hp).astype(jnp.float32)
    b2p = b2.reshape(1, 1).astype(jnp.float32)

    cost = pl.CostEstimate(
        flops=2 * b_pad * kp * hp + 3 * b_pad * hp,
        transcendentals=b_pad * hp,
        bytes_accessed=(xp.size * 2) + (w1p.size * 2)
                       + (b1p.size + w2p.size + b2p.size) * 4 + b_pad * 4,
    )

    out_row = pl.pallas_call(
        generator_kernel,
        out_shape=jax.ShapeDtypeStruct((1, b_pad), jnp.float32),
        grid=grid,
        in_specs=[
            pl.BlockSpec((tb, kp), lambda i: (i, 0)),              # x: streamed tiles
            pl.BlockSpec((kp, hp), lambda i: (0, 0)),              # W1: resident
            pl.BlockSpec((1, hp), lambda i: (0, 0)),               # b1: resident
            pl.BlockSpec((1, hp), lambda i: (0, 0)),               # w2 row: resident
            pl.BlockSpec(memory_space=pltpu.MemorySpace.SMEM),     # b2 scalar
        ],
        out_specs=pl.BlockSpec((1, tb), lambda i: (0, i)),         # lane-dense row
        compiler_params=pltpu.CompilerParams(
            dimension_semantics=("parallel",),   # shard batch tiles across v7x's 2 TCs
            vmem_limit_bytes=32 * 1024 * 1024,
        ),
        cost_estimate=cost,
    )(xp, w1p, b1p, w2p, b2p)

    # Back to the module's (B, 1) column layout; drop batch padding.
    return out_row[0, :B].reshape(B, out_dim)


def init_generator_params(key, input_dim=100, hidden_dim=128, output_dim=1):
    """Deterministic init mimicking torch.nn.Linear default:
    U(-1/sqrt(fan_in), 1/sqrt(fan_in)) for both weight and bias.
    Weights are stored as [in_features, out_features] (i.e. torch weight.T)."""
    k1, k2, k3, k4 = jax.random.split(key, 4)
    bound1 = 1.0 / jnp.sqrt(jnp.float32(input_dim))
    bound2 = 1.0 / jnp.sqrt(jnp.float32(hidden_dim))
    w1 = jax.random.uniform(k1, (input_dim, hidden_dim), jnp.float32, -bound1, bound1)
    b1 = jax.random.uniform(k2, (hidden_dim,), jnp.float32, -bound1, bound1)
    w2 = jax.random.uniform(k3, (hidden_dim, output_dim), jnp.float32, -bound2, bound2)
    b2 = jax.random.uniform(k4, (output_dim,), jnp.float32, -bound2, bound2)
    return w1, b1, w2, b2


if __name__ == "__main__":
    key = jax.random.PRNGKey(0)
    k_x, k_p = jax.random.split(key)

    batch, input_dim, hidden_dim, output_dim = 8, 100, 128, 1
    x = jax.random.normal(k_x, (batch, input_dim), jnp.float32)
    w1, b1, w2, b2 = init_generator_params(k_p, input_dim, hidden_dim, output_dim)

    fwd = jax.jit(generator_forward)
    out = jax.block_until_ready(fwd(x, w1, b1, w2, b2))

    # Plain-JAX f32 reference of the PyTorch module's forward.
    ref = jnp.tanh(x @ w1 + b1) @ w2 + b2
    assert out.shape == (batch, output_dim)
    # Layer-1 MXU operands are bf16 -> compare against the f32 reference with
    # a correspondingly loosened tolerance.
    err = float(jnp.max(jnp.abs(out - ref)))
    assert jnp.allclose(out, ref, atol=2e-2, rtol=2e-2), f"max abs err {err}"

    print("KERNEL_OK")
</pallas_src>

<mosaic_0001>
module attributes {stable_mosaic.version = 11 : i64} {
  func.func @generator_kernel(%arg0: i32, %arg1: memref<128x128xbf16, #tpu.memory_space<vmem>>, %arg2: memref<128x128xbf16, #tpu.memory_space<vmem>>, %arg3: memref<1x128xf32, #tpu.memory_space<vmem>>, %arg4: memref<1x128xf32, #tpu.memory_space<vmem>>, %arg5: memref<1x1xf32, #tpu.memory_space<smem>>, %arg6: memref<1x128xf32, #tpu.memory_space<vmem>>) attributes {dimension_semantics = [#tpu.dimension_semantics<parallel>], iteration_bounds = array<i64: 1>, scalar_prefetch = 0 : i64, scratch_operands = 0 : i64, tpu.core_type = #tpu.core_type<tc>, window_params = [{transform_indices = @transform_0, window_bounds = array<i64: 128, 128>}, {pipeline_mode = #tpu.pipeline_mode<synchronous>, transform_indices = @transform_1, window_bounds = array<i64: 128, 128>}, {pipeline_mode = #tpu.pipeline_mode<synchronous>, transform_indices = @transform_2, window_bounds = array<i64: 1, 128>}, {pipeline_mode = #tpu.pipeline_mode<synchronous>, transform_indices = @transform_3, window_bounds = array<i64: 1, 128>}, {transform_indices = @transform_4, window_bounds = array<i64: 1, 1>}, {transform_indices = @transform_5, window_bounds = array<i64: 1, 128>}]} {
    %c0 = arith.constant 0 : index
    %c0_0 = arith.constant 0 : index
    %0 = vector.load %arg1[%c0, %c0_0] : memref<128x128xbf16, #tpu.memory_space<vmem>>, vector<128x128xbf16>
    %c0_1 = arith.constant 0 : index
    %c0_2 = arith.constant 0 : index
    %1 = vector.load %arg2[%c0_1, %c0_2] : memref<128x128xbf16, #tpu.memory_space<vmem>>, vector<128x128xbf16>
    %cst = arith.constant dense<0.000000e+00> : vector<128x128xf32>
    %2 = tpu.matmul %0, %1, %cst {dimension_numbers = #tpu.dot_dimension_numbers<[1], [0], [0], [1], [0, 0, 1, 1], [], []>} : vector<128x128xbf16>, vector<128x128xbf16>, vector<128x128xf32> -> vector<128x128xf32>
    %c0_3 = arith.constant 0 : index
    %c0_4 = arith.constant 0 : index
    %3 = vector.load %arg3[%c0_3, %c0_4] : memref<1x128xf32, #tpu.memory_space<vmem>>, vector<1x128xf32>
    %4 = vector.broadcast %3 : vector<1x128xf32> to vector<128x128xf32>
    %5 = arith.addf %2, %4 : vector<128x128xf32>
    %6 = math.tanh %5 : vector<128x128xf32>
    %c0_5 = arith.constant 0 : index
    %c0_6 = arith.constant 0 : index
    %7 = vector.load %arg4[%c0_5, %c0_6] : memref<1x128xf32, #tpu.memory_space<vmem>>, vector<1x128xf32>
    %8 = vector.broadcast %7 : vector<1x128xf32> to vector<128x128xf32>
    %9 = arith.mulf %6, %8 : vector<128x128xf32>
    %cst_7 = arith.constant dense<0.000000e+00> : vector<128xf32>
    %10 = vector.multi_reduction <add>, %9, %cst_7 [1] : vector<128x128xf32> to vector<128xf32>
    %c0_8 = arith.constant 0 : index
    %c0_9 = arith.constant 0 : index
    %11 = memref.load %arg5[%c0_8, %c0_9] : memref<1x1xf32, #tpu.memory_space<smem>>
    %12 = vector.broadcast %11 : f32 to vector<128xf32>
    %13 = arith.addf %10, %12 : vector<128xf32>
    %14 = vector.shape_cast %13 : vector<128xf32> to vector<1x128xf32>
    %c0_10 = arith.constant 0 : index
    %c0_11 = arith.constant 0 : index
    %15 = vector.load %arg6[%c0_10, %c0_11] : memref<1x128xf32, #tpu.memory_space<vmem>>, vector<1x128xf32>
    tpu.vector_store %arg6[%c0_10, %c0_11], %14 {strides = array<i32>} : memref<1x128xf32, #tpu.memory_space<vmem>>, vector<1x128xf32>,
    return
  }
  func.func @transform_0(%arg0: i32) -> (i32, i32) {
    %c0_i32 = arith.constant 0 : i32
    %c0_i32_0 = arith.constant 0 : i32
    return %arg0, %c0_i32 : i32, i32
  }
  func.func @transform_1(%arg0: i32) -> (i32, i32) {
    %c0_i32 = arith.constant 0 : i32
    %c0_i32_0 = arith.constant 0 : i32
    %c0_i32_1 = arith.constant 0 : i32
    return %c0_i32, %c0_i32_0 : i32, i32
  }
  func.func @transform_2(%arg0: i32) -> (i32, i32) {
    %c0_i32 = arith.constant 0 : i32
    %c0_i32_0 = arith.constant 0 : i32
    %c0_i32_1 = arith.constant 0 : i32
    return %c0_i32, %c0_i32_0 : i32, i32
  }
  func.func @transform_3(%arg0: i32) -> (i32, i32) {
    %c0_i32 = arith.constant 0 : i32
    %c0_i32_0 = arith.constant 0 : i32
    %c0_i32_1 = arith.constant 0 : i32
    return %c0_i32, %c0_i32_0 : i32, i32
  }
  func.func @transform_4(%arg0: i32) -> (i32, i32) {
    %c0_i32 = arith.constant 0 : i32
    %c0_i32_0 = arith.constant 0 : i32
    %c0_i32_1 = arith.constant 0 : i32
    return %c0_i32, %c0_i32_0 : i32, i32
  }
  func.func @transform_5(%arg0: i32) -> (i32, i32) {
    %c0_i32 = arith.constant 0 : i32
    %c0_i32_0 = arith.constant 0 : i32
    return %c0_i32, %arg0 : i32, i32
  }
}

</mosaic_0001>

<bundles_post_ra>
// kernel: generator_forward.1
= control target key start
LH: loop header
LB: loop body
LE: loop exit
PB: predicated region body
PF: predicated region fallthrough
CT: control target
= control target key end

     0   :  { %vm370_vm0 = vcmask 130112   ;;  %vm377_vm1 = vcmask 195712   ;;  %vm384_vm2 = vcmask 261312   ;;  %vm391_vm3 = vcmask 326912   ;;  %s798_s1 = inlined_call_operand.vmem [shape: bf16[128,128], index: 1, kind: input, shape index: {}]   ;;  %s799_s0 = inlined_call_operand.vmem [shape: bf16[128,128], index: 0, kind: input, shape index: {}]   ;;  %s800_s2 = inlined_call_operand.vmem [shape: f32[1,128], index: 2, kind: input, shape index: {}]   ;;  %s801_s3 = inlined_call_operand.vmem [shape: f32[1,128], index: 3, kind: input, shape index: {}]   ;;  %s802_s4 = inlined_call_operand.<no memory space> [shape: f32[1,1], index: 4, kind: input, shape index: {}]   ;;  %s803_s5 = inlined_call_operand.vmem [shape: f32[1,128], index: 5, kind: output, shape index: {}]  }
   0x1   :  { %v558_v0 = vld [vmem:[%s798_s1] sm:$0xff]   ;;  %v559_v1 = vld [vmem:[%s798_s1 + $0x8] sm:$0xff]   ;;  %v560_v2 = vld [vmem:[%s798_s1 + $0x10] sm:$0xff]   ;;  %vm398_vm4 = vcmask 392512   ;;  %vm405_vm5 = vcmask 458112   ;;  %vm412_vm6 = vcmask 523712  }
   0x2   :  { %510 = vmatprep.subr.bf16.mxu0 %v558_v0  ;;  %542 = vmatprep.subr.bf16.mxu1 %v558_v0  ;;  %v561_v3 = vld [vmem:[%s798_s1 + $0x18] sm:$0xff]   ;;  %v566_v4 = vld [vmem:[%s799_s0] sm:$0xff]   ;;  %v563_v7 = vld [vmem:[%s798_s1 + $0x28] sm:$0xff]   ;;  %vm419_vm7 = vcmask 589312   ;;  %vm426_vm8 = vcmask 654912   ;;  %vm433_vm9 = vcmask 720512  }
   0x3   :  { %511 = vmatpush3.bf16.msra.mxu0 %v558_v0  ;;  %550 = vmatpush3.bf16.msra.mxu1 %v558_v0  ;;  %v568_v5 = vld [vmem:[%s799_s0 + $0x20] sm:$0xff]   ;;  %v564_v8 = vld [vmem:[%s798_s1 + $0x30] sm:$0xff]   ;;  %v565_v9 = vld [vmem:[%s798_s1 + $0x38] sm:$0xff]   ;;  %vm440_vm10 = vcmask 786112   ;;  %vm447_vm11 = vcmask 851712   ;;  %vm454_vm12 = vcmask 917312  }
   0x4   :  { %512 = vmatprep.subr.bf16.mxu0 %v559_v1  ;;  %543 = vmatprep.subr.bf16.mxu1 %v559_v1  ;;  %v562_v6 = vld [vmem:[%s798_s1 + $0x20] sm:$0xff]   ;;  %v567_v10 = vld [vmem:[%s799_s0 + $0x8] sm:$0xff]   ;;  %v570_v12 = vld [vmem:[%s799_s0 + $0x10] sm:$0xff]   ;;  %vm461_vm13 = vcmask 982912   ;;  %vm468_vm14 = vcmask 1048512  }
   0x5   :  { %526 = vmatprep.mubr.bf16.mxu0 %v566_v4  ;;  %534 = vmatprep.mubr.bf16.mxu1 %v568_v5  ;;  %v569_v11 = vld [vmem:[%s799_s0 + $0x28] sm:$0xff]   ;;  %v572_v13 = vld [vmem:[%s799_s0 + $0x30] sm:$0xff]   ;;  %v571_v14 = vld [vmem:[%s799_s0 + $0x18] sm:$0xff]  }
   0x6   :  { %v573_v15 = vld [vmem:[%s799_s0 + $0x38] sm:$0xff]   ;;  %v687_v16 = vld [vmem:[%s800_s2] ss:$0 sm:$0xff] }
   0x7   :  { %513 = vmatpush3.bf16.msra.mxu0 %v559_v1  ;;  %551 = vmatpush3.bf16.msra.mxu1 %v559_v1  ;;  %v700_v40 = vld [vmem:[%s801_s3] ss:$0 sm:$0xff] }
   0x8   :  { %514 = vmatprep.subr.bf16.mxu0 %v560_v2  ;;  %544 = vmatprep.subr.bf16.mxu1 %v560_v2 }
   0xb   :  { %515 = vmatpush3.bf16.msra.mxu0 %v560_v2  ;;  %552 = vmatpush3.bf16.msra.mxu1 %v560_v2 }
   0xc   :  { %516 = vmatprep.subr.bf16.mxu0 %v561_v3  ;;  %545 = vmatprep.subr.bf16.mxu1 %v561_v3 }
   0xf   :  { %517 = vmatpush3.bf16.msra.mxu0 %v561_v3  ;;  %553 = vmatpush3.bf16.msra.mxu1 %v561_v3 }
  0x10   :  { %518 = vmatprep.subr.bf16.mxu0 %v562_v6  ;;  %546 = vmatprep.subr.bf16.mxu1 %v562_v6 }
  0x13   :  { %519 = vmatpush3.bf16.msra.mxu0 %v562_v6  ;;  %554 = vmatpush3.bf16.msra.mxu1 %v562_v6 }
  0x14   :  { %520 = vmatprep.subr.bf16.mxu0 %v563_v7  ;;  %547 = vmatprep.subr.bf16.mxu1 %v563_v7 }
  0x17   :  { %521 = vmatpush3.bf16.msra.mxu0 %v563_v7  ;;  %555 = vmatpush3.bf16.msra.mxu1 %v563_v7 }
  0x18   :  { %522 = vmatprep.subr.bf16.mxu0 %v564_v8  ;;  %548 = vmatprep.subr.bf16.mxu1 %v564_v8 }
  0x1b   :  { %523 = vmatpush3.bf16.msra.mxu0 %v564_v8  ;;  %556 = vmatpush3.bf16.msra.mxu1 %v564_v8 }
  0x1c   :  { %524 = vmatprep.subr.bf16.mxu0 %v565_v9  ;;  %549 = vmatprep.subr.bf16.mxu1 %v565_v9 }
  0x1f   :  { %525 = vmatpush3.bf16.msra.mxu0 %v565_v9  ;;  %557 = vmatpush3.bf16.msra.mxu1 %v565_v9 }
  0x22   :  { %527 = vmatmul.mubr.bf16.vlgmr.msra.gmra.mrb[0].mxu0 %v567_v10  ;;  %535 = vmatmul.mubr.bf16.vlgmr.msra.gmra.mrb[0].mxu1 %v569_v11 }
  0x23   :  { %530 = vmatprep.mubr.bf16.mxu0 %v570_v12  ;;  %538 = vmatprep.mubr.bf16.mxu1 %v572_v13 }
  0x2a   :  { %531 = vmatmul.mubr.bf16.gmra.mrb[4].mxu0 %v571_v14  ;;  %539 = vmatmul.mubr.bf16.gmra.mrb[4].mxu1 %v573_v15 }
  0xf5   :  { %v528_v17 = vpop.f32.mrb[0].mxu0  ;;  %v536_v18 = vpop.f32.mrb[0].mxu1 }
  0xf6   :  { %v200_v19 = vadd.f32 %v528_v17, %v687_v16  ;;  %v191_v20 = vpop.f32.mrb[1].mxu0  ;;  %v223_v21 = vpop.f32.mrb[1].mxu1  ;;  %v232_v51 = vadd.f32 %v536_v18, %v687_v16  ;;  %v359_v18 = vlaneseq }
  0xf7   :  { %v192_v22 = vadd.f32 %v687_v16, %v191_v20  ;;  %v529_v23 = vpop.f32.mrb[2].mxu0  ;;  %v537_v24 = vpop.f32.mrb[2].mxu1  ;;  %v224_v26 = vadd.f32 %v687_v16, %v223_v21 }
  0xf8   :  { %574 = vtanh.f32 %v200_v19  ;;  %v203_v25 = vadd.f32 %v529_v23, %v687_v16  ;;  %v194_v27 = vpop.f32.mrb[3].mxu0  ;;  %v226_v28 = vpop.f32.mrb[3].mxu1  ;;  %v235_v50 = vadd.f32 %v537_v24, %v687_v16  ;;  %v726_v21 = vand.u32 127, %v359_v18 }
  0xf9   :  { %576 = vtanh.f32 %v192_v22  ;;  %v195_v29 = vadd.f32 %v687_v16, %v194_v27  ;;  %v227_v30 = vadd.f32 %v687_v16, %v226_v28  ;;  %v729_v24 = vshrl.u32 %v359_v18, 7 }
  0xfa   :  { %578 = vtanh.f32 %v203_v25  ;;  %v365_v23 = vadd.s32 4294967288, %v726_v21  ;;  %v372_v27 = vadd.s32 4294967280, %v726_v21 }
  0xfb   :  { %580 = vtanh.f32 %v224_v26  ;;  %v734_v26 = vstv %s802_s4 }
  0xfc   :  { %582 = vtanh.f32 %v195_v29  ;;  %v368_v29 = vsub.s32 %v365_v23, %v729_v24 }
  0xfd   :  { %v532_v31 = vpop.f32.mrb[4].mxu0  ;;  %v540_v32 = vpop.f32.mrb[4].mxu1  ;;  %584 = vtanh.f32 %v227_v30  ;;  %v363_v30 = vsub.s32 %v726_v21, %v729_v24 }
  0xfe   :  { %v216_v33 = vadd.f32 %v532_v31, %v687_v16  ;;  %v207_v34 = vpop.f32.mrb[5].mxu0  ;;  %v239_v35 = vpop.f32.mrb[5].mxu1  ;;  %v248_v1 = vadd.f32 %v540_v32, %v687_v16  ;;  %v379_v32 = vadd.s32 4294967272, %v726_v21 }
  0xff   :  { %v533_v36 = vpop.f32.mrb[6].mxu0  ;;  %v541_v37 = vpop.f32.mrb[6].mxu1  ;;  %v208_v45 = vadd.f32 %v687_v16, %v207_v34  ;;  %v240_v58 = vadd.f32 %v687_v16, %v239_v35  ;;  %v744_v35 = vadd.s32 4294967224, %v726_v21 }
 0x100   :  { %v219_v38 = vadd.f32 %v533_v36, %v687_v16  ;;  %v210_v39 = vpop.f32.mrb[7].mxu0  ;;  %v242_v41 = vpop.f32.mrb[7].mxu1  ;;  %586 = vtanh.f32 %v216_v33  ;;  %v251_v63 = vadd.f32 %v541_v37, %v687_v16  ;;  %v414_v33 = vadd.s32 4294967232, %v726_v21 }
 0x101   :  { %v211_v43 = vadd.f32 %v687_v16, %v210_v39  ;;  %v243_v55 = vadd.f32 %v687_v16, %v242_v41  ;;  %v407_v37 = vadd.s32 4294967240, %v726_v21  ;;  %v400_v39 = vadd.s32 4294967248, %v726_v21 }
 0x102   :  { %v575_v42 = vpop.eup %574  ;;  %588 = vtanh.f32 %v219_v38  ;;  %v375_v38 = vsub.s32 %v372_v27, %v729_v24  ;;  %v456_v27 = vadd.s32 4294967184, %v726_v21 }
 0x103   :  { %v577_v44 = vpop.eup %576  ;;  %v279_v46 = vmul.f32 %v575_v42, %v700_v40  ;;  %590 = vtanh.f32 %v211_v43 }
 0x104   :  { %v277_v47 = vmul.f32 %v577_v44, %v700_v40  ;;  %v579_v48 = vpop.eup %578  ;;  %592 = vtanh.f32 %v208_v45  ;;  %v386_v44 = vadd.s32 4294967264, %v726_v21 }
 0x105   :  { %297 = vadd.xlane.f32.xlu1 %v279_v46  ;;  %v581_v49 = vpop.eup %580  ;;  %v280_v52 = vmul.f32 %v579_v48, %v700_v40  ;;  %594 = vtanh.f32 %v235_v50  ;;  %v382_v46 = vsub.s32 %v379_v32, %v729_v24  ;;  %v410_v50 = vsub.s32 %v407_v37, %v729_v24 }
 0x106   :  { %293 = vadd.xlane.f32.xlu0 %v277_v47  ;;  %v285_v53 = vmul.f32 %v581_v49, %v700_v40  ;;  %v583_v54 = vpop.eup %582  ;;  %596 = vtanh.f32 %v232_v51  ;;  %v417_v47 = vsub.s32 %v414_v33, %v729_v24  ;;  %v424_v49 = vsub.s32 %v744_v35, %v729_v24 }
 0x107   :  { %v585_v56 = vpop.eup %584  ;;  %598 = vtanh.f32 %v243_v55  ;;  %v278_v61 = vmul.f32 %v583_v54, %v700_v40  ;;  %v435_v51 = vadd.s32 4294967208, %v726_v21  ;;  %v403_v54 = vsub.s32 %v400_v39, %v729_v24 }
 0x108   :  { %v286_v59 = vmul.f32 %v585_v56, %v700_v40  ;;  %600 = vtanh.f32 %v240_v58  ;;  %v389_v58 = vsub.s32 %v386_v44, %v729_v24  ;;  %v463_v32 = vadd.s32 4294967176, %v726_v21 }
 0x109   :  { %299 = vadd.xlane.f32.xlu1 %v280_v52  ;;  %602 = vtanh.f32 %v251_v63 }
 0x10a   :  { %309 = vadd.xlane.f32.xlu0 %v285_v53  ;;  %v587_v57 = vpop.eup %586  ;;  %604 = vtanh.f32 %v248_v1  ;;  %v438_v1 = vsub.s32 %v435_v51, %v729_v24 }
 0x10b   :  { %v283_v0 = vmul.f32 %v587_v57, %v700_v40 }
 0x10c   :  { %v589_v60 = vpop.eup %588 }
 0x10d   :  { %311 = vadd.xlane.f32.xlu1 %v286_v59  ;;  %v284_v62 = vmul.f32 %v589_v60, %v700_v40  ;;  %v591_v2 = vpop.eup %590  ;;  %v428_v59 = vadd.s32 4294967216, %v726_v21 }
 0x10e   :  { %295 = vadd.xlane.f32.xlu0 %v278_v61  ;;  %v593_v3 = vpop.eup %592  ;;  %v282_v4 = vmul.f32 %v591_v2, %v700_v40 }
 0x10f   :  { %v595_v5 = vpop.eup %594  ;;  %v281_v6 = vmul.f32 %v593_v3, %v700_v40 }
 0x110   :  { %v597_v7 = vpop.eup %596  ;;  %v288_v9 = vmul.f32 %v595_v5, %v700_v40 }
 0x111   :  { %307 = vadd.xlane.f32.xlu1 %v284_v62  ;;  %v599_v8 = vpop.eup %598  ;;  %v287_v10 = vmul.f32 %v597_v7, %v700_v40  ;;  %v431_v7 = vsub.s32 %v428_v59, %v729_v24 }
 0x112   :  { %305 = vadd.xlane.f32.xlu0 %v283_v0  ;;  %v601_v11 = vpop.eup %600  ;;  %v290_v12 = vmul.f32 %v599_v8, %v700_v40  ;;  %v442_v8 = vadd.s32 4294967200, %v726_v21 }
 0x113   :  { %v603_v13 = vpop.eup %602  ;;  %v289_v14 = vmul.f32 %v601_v11, %v700_v40 }
 0x114   :  { %v605_v15 = vpop.eup %604  ;;  %v292_v16 = vmul.f32 %v603_v13, %v700_v40  ;;  %v449_v13 = vadd.s32 4294967192, %v726_v21 }
 0x115   :  { %303 = vadd.xlane.f32.xlu1 %v282_v4  ;;  %v291_v17 = vmul.f32 %v605_v15, %v700_v40  ;;  %v393_v40 = vadd.s32 4294967256, %v726_v21  ;;  %v466_v21 = vsub.s32 %v463_v32, %v729_v24 }
 0x116   :  { %301 = vadd.xlane.f32.xlu0 %v281_v6 }
 0x117   :  { %v396_v55 = vsub.s32 %v393_v40, %v729_v24 }
 0x119   :  { %315 = vadd.xlane.f32.xlu1 %v288_v9 }
 0x11a   :  { %313 = vadd.xlane.f32.xlu0 %v287_v10 }
 0x11d   :  { %319 = vadd.xlane.f32.xlu1 %v290_v12 }
 0x11e   :  { %317 = vadd.xlane.f32.xlu0 %v289_v14 }
 0x121   :  { %323 = vadd.xlane.f32.xlu1 %v292_v16 }
 0x122   :  { %321 = vadd.xlane.f32.xlu0 %v291_v17 }
 0x192   :  { %v298_v19 = vpop.xlane.xlu1 %297 }
 0x193   :  { %v294_v20 = vpop.xlane.xlu0 %293  ;;  %v329_v41 = vadd.f32 %v734_v26, %v298_v19 }
 0x194   :  { %v327_v31 = vadd.f32 %v734_v26, %v294_v20 }
 0x195   :  { %v376_v56 = vrot.slane %v329_v41, %v375_v38 }
 0x196   :  { %v300_v22 = vpop.xlane.xlu1 %299  ;;  %v364_v45 = vrot.slane %v327_v31, %v363_v30  ;;  %v452_v30 = vsub.s32 %v449_v13, %v729_v24 }
 0x197   :  { %v310_v25 = vpop.xlane.xlu0 %309  ;;  %v330_v52 = vadd.f32 %v734_v26, %v300_v22 }
 0x198   :  { %v335_v4 = vadd.f32 %v734_v26, %v310_v25  ;;  %v445_v25 = vsub.s32 %v442_v8, %v729_v24 }
 0x199   :  { %v383_v2 = vrot.slane %v330_v52, %v382_v46 }
 0x19a   :  { %v312_v28 = vpop.xlane.xlu1 %311  ;;  %v418_v20 = vrot.slane %v335_v4, %v417_v47 }
 0x19b   :  { %v296_v34 = vpop.xlane.xlu0 %295  ;;  %v336_v9 = vadd.f32 %v734_v26, %v312_v28 }
 0x19c   :  { %v328_v36 = vadd.f32 %v734_v26, %v296_v34 }
 0x19d   :  { %v425_v28 = vrot.slane %v336_v9, %v424_v49 }
 0x19e   :  { %v369_v42 = vrot.slane %v328_v36, %v368_v29  ;;  %v308_v43 = vpop.xlane.xlu1 %307 }
 0x19f   :  { %v306_v48 = vpop.xlane.xlu0 %305  ;;  %v334_v3 = vadd.f32 %v734_v26, %v308_v43 }
 0x1a0   :  { %v371_v53 = vsel %vm370_vm0, %v369_v42, %v364_v45  ;;  %v333_v63 = vadd.f32 %v734_v26, %v306_v48  ;;  %v459_v42 = vsub.s32 %v456_v27, %v729_v24 }
 0x1a1   :  { %v378_v62 = vsel %vm377_vm1, %v376_v56, %v371_v53  ;;  %v411_v17 = vrot.slane %v334_v3, %v410_v50 }
 0x1a2   :  { %v304_v57 = vpop.xlane.xlu1 %303  ;;  %v385_v11 = vsel %vm384_vm2, %v383_v2, %v378_v62  ;;  %v404_v14 = vrot.slane %v333_v63, %v403_v54 }
 0x1a3   :  { %v332_v60 = vadd.f32 %v734_v26, %v304_v57  ;;  %v302_v61 = vpop.xlane.xlu0 %301 }
 0x1a4   :  { %v331_v0 = vadd.f32 %v734_v26, %v302_v61 }
 0x1a5   :  { %v397_v10 = vrot.slane %v332_v60, %v396_v55 }
 0x1a6   :  { %v390_v5 = vrot.slane %v331_v0, %v389_v58  ;;  %v316_v6 = vpop.xlane.xlu1 %315 }
 0x1a7   :  { %v314_v12 = vpop.xlane.xlu0 %313  ;;  %v338_v19 = vadd.f32 %v734_v26, %v316_v6 }
 0x1a8   :  { %v392_v15 = vsel %vm391_vm3, %v390_v5, %v385_v11  ;;  %v337_v16 = vadd.f32 %v734_v26, %v314_v12 }
 0x1a9   :  { %v399_v18 = vsel %vm398_vm4, %v397_v10, %v392_v15  ;;  %v439_v36 = vrot.slane %v338_v19, %v438_v1 }
 0x1aa   :  { %v406_v22 = vsel %vm405_vm5, %v404_v14, %v399_v18  ;;  %v320_v23 = vpop.xlane.xlu1 %319  ;;  %v432_v34 = vrot.slane %v337_v16, %v431_v7 }
 0x1ab   :  { %v413_v29 = vsel %vm412_vm6, %v411_v17, %v406_v22  ;;  %v318_v31 = vpop.xlane.xlu0 %317  ;;  %v340_v38 = vadd.f32 %v734_v26, %v320_v23 }
 0x1ac   :  { %v420_v33 = vsel %vm419_vm7, %v418_v20, %v413_v29  ;;  %v339_v35 = vadd.f32 %v734_v26, %v318_v31 }
 0x1ad   :  { %v427_v37 = vsel %vm426_vm8, %v425_v28, %v420_v33  ;;  %v453_v48 = vrot.slane %v340_v38, %v452_v30 }
 0x1ae   :  { %v434_v39 = vsel %vm433_vm9, %v432_v34, %v427_v37  ;;  %v446_v40 = vrot.slane %v339_v35, %v445_v25  ;;  %v324_v41 = vpop.xlane.xlu1 %323 }
 0x1af   :  { %v441_v43 = vsel %vm440_vm10, %v439_v36, %v434_v39  ;;  %v342_v44 = vadd.f32 %v734_v26, %v324_v41  ;;  %v322_v45 = vpop.xlane.xlu0 %321 }
 0x1b0   :  { %v448_v46 = vsel %vm447_vm11, %v446_v40, %v441_v43  ;;  %v341_v47 = vadd.f32 %v734_v26, %v322_v45 }
 0x1b1   :  { %v467_v50 = vrot.slane %v342_v44, %v466_v21  ;;  %v455_v51 = vsel %vm454_vm12, %v453_v48, %v448_v46 }
 0x1b2   :  { %v460_v49 = vrot.slane %v341_v47, %v459_v42 }
 0x1b4   :  { %v462_v52 = vsel %vm461_vm13, %v460_v49, %v455_v51 }
 0x1b5   :  { %v469_v53 = vsel %vm468_vm14, %v467_v50, %v462_v52 }
 0x1b6   :  { %471 = vst [vmem:[%s803_s5] sm:$0x1] %v469_v53 }

</bundles_post_ra>
